<compile_context>
chip_gen: v7x
topology: tpu7x:2x2x1
jax: 0.10.0
libtpu: 0.0.40
codegen_flags: <defaults>
</compile_context>

<pallas_src>
import numpy as np
import jax
import jax.numpy as jnp
from jax.experimental import pallas as pl
from jax.experimental.pallas import tpu as pltpu


def _rff_kernel(x_ref, bt_ref, out_ref):
    # x_ref:   (tb, K)       f32 batch tile (K tiny, lane-padded in VMEM)
    # bt_ref:  (K, M_pad)    f32 == 2*pi * B.T, lane-dense, resident across steps
    # out_ref: (tb, 2*M_pad) cos half then sin half
    k = x_ref.shape[1]
    m = bt_ref.shape[1]
    # proj = x @ (2*pi*B).T computed as K VPU broadcast FMAs (outer-product form);
    # avoids pushing a K=2 contraction through the MXU / transposing a (M, 2) tile.
    proj = x_ref[:, 0:1] * bt_ref[0:1, :]
    for j in range(1, k):  # K is a small static trace-time constant
        proj = proj + x_ref[:, j : j + 1] * bt_ref[j : j + 1, :]
    out_ref[:, :m] = jnp.cos(proj).astype(out_ref.dtype)
    out_ref[:, m:] = jnp.sin(proj).astype(out_ref.dtype)


def _round_up(x, m):
    return ((x + m - 1) // m) * m


def _choose_tb(batch, out_row_bytes, block_batch=None):
    """Pick the batch tile size.

    - Budget ~32 MiB of double-buffered data (out tile + lane-padded x tile),
      which fits v7x's 64 MiB physical VMEM with headroom and is tiny on v5e/v6e.
    - Floor the tile at ~2 MiB of output so the ~0.35us/step pipeline overhead
      stays small relative to HBM writeback.
    - Cap at ceil(batch/4) so large batches produce several grid steps and both
      v7x TensorCores get work (grid axis is "parallel").
    """
    if batch <= 8:
        return batch
    x_row_bytes = 128 * 4  # (tb, K) tile is lane-padded to 128 f32 lanes in VMEM
    per_row = 2 * (out_row_bytes + x_row_bytes)  # double-buffered
    budget = 32 << 20
    tb_vmem = max(8, ((budget // per_row) // 8) * 8)

    rows_floor = max(1024, (((2 << 20) // max(out_row_bytes, 1)) // 8) * 8)
    rows_par = _round_up(-(-batch // 4), 8)
    tb = min(tb_vmem, max(rows_floor, rows_par))
    if block_batch is not None:
        tb = min(tb, max(8, (block_batch // 8) * 8))
    if tb >= batch:
        return batch  # single full-extent block (always a legal block shape)
    return tb


def rff_forward(x, B, *, block_batch=None, out_dtype=jnp.float32):
    """Random Fourier Features forward.

    x: (batch, input_dim) f32
    B: (mapping_size, input_dim) f32 (fixed, non-trainable projection matrix)
    returns (batch, 2*mapping_size) = [cos(2*pi*x@B.T), sin(2*pi*x@B.T)]
    """
    batch, input_dim = x.shape
    mapping_size, k = B.shape
    assert k == input_dim, (B.shape, x.shape)

    # Fold the 2*pi scale into the constant projection and pre-transpose to a
    # lane-dense (K, M) layout (one tiny host-side op on a fixed parameter).
    bt = ((2.0 * np.pi) * B.astype(jnp.float32)).T  # (K, M)

    # Pad M to a multiple of 128 when M > 128 so both half-writes of the output
    # are unmasked full-lane stores.  Pad columns (cos(0)=1, sin(0)=0) are
    # sliced off below.  For M <= 128 the block just spans the full width.
    if mapping_size > 128 and mapping_size % 128 != 0:
        m_pad = _round_up(mapping_size, 128)
        bt = jnp.pad(bt, ((0, 0), (0, m_pad - mapping_size)))
    else:
        m_pad = mapping_size
    out_width = 2 * m_pad

    out_itemsize = jnp.dtype(out_dtype).itemsize
    out_row_bytes = out_width * out_itemsize
    tb = _choose_tb(batch, out_row_bytes, block_batch)
    grid = ((batch + tb - 1) // tb,)

    # VMEM scoped limit from the actual double-buffered footprint (+ headroom),
    # clamped to a range that is safe on every generation (v7x: 64 MiB physical).
    bt_bytes = _round_up(input_dim, 8) * m_pad * 4
    footprint = 2 * tb * (out_row_bytes + 128 * 4) + 2 * bt_bytes
    vmem_limit = int(min(max(footprint + (8 << 20), 32 << 20), 48 << 20))

    out = pl.pallas_call(
        _rff_kernel,
        out_shape=jax.ShapeDtypeStruct((batch, out_width), out_dtype),
        grid_spec=pltpu.PrefetchScalarGridSpec(
            num_scalar_prefetch=0,
            grid=grid,
            in_specs=[
                # x: one batch tile per grid step (double-buffered DMA).
                pl.BlockSpec((tb, input_dim), lambda i: (i, 0)),
                # B_T: same block every step -> stays resident in VMEM.
                pl.BlockSpec((input_dim, m_pad), lambda i: (0, 0)),
            ],
            out_specs=pl.BlockSpec((tb, out_width), lambda i: (i, 0)),
        ),
        compiler_params=pltpu.CompilerParams(
            # Batch tiles are independent: shard across TensorCores (v7x).
            dimension_semantics=("parallel",),
            vmem_limit_bytes=vmem_limit,
        ),
    )(x, bt)

    if m_pad != mapping_size:
        out = jnp.concatenate(
            [out[:, :mapping_size], out[:, m_pad : m_pad + mapping_size]], axis=1
        )
    return out


def _reference(x, B):
    # Pure-JAX mirror of the PyTorch forward (scale applied after the matmul).
    proj = 2.0 * np.pi * (x @ B.T)
    return jnp.concatenate([jnp.cos(proj), jnp.sin(proj)], axis=1)


if __name__ == "__main__":
    key = jax.random.PRNGKey(0)
    k1, k2, k3, k4 = jax.random.split(key, 4)

    # 1) Small shapes consistent with the module (mountain-car state is 2-D).
    batch, input_dim, mapping_size, scale = 8, 2, 32, 1.0
    x_small = jax.random.normal(k1, (batch, input_dim), dtype=jnp.float32)
    B_small = scale * jax.random.normal(k2, (mapping_size, input_dim), dtype=jnp.float32)
    out_small = jax.block_until_ready(rff_forward(x_small, B_small))
    np.testing.assert_allclose(
        np.asarray(out_small), np.asarray(_reference(x_small, B_small)),
        rtol=1e-4, atol=1e-4,
    )

    # 2) Exercise the batch-tiled (grid > 1), lane-dense path: 2*M = 256 and a
    #    batch large enough to split into multiple tiles.
    x_big = jax.random.normal(k3, (4096, 2), dtype=jnp.float32)
    B_big = jax.random.normal(k4, (128, 2), dtype=jnp.float32)
    out_big = jax.block_until_ready(rff_forward(x_big, B_big))
    np.testing.assert_allclose(
        np.asarray(out_big), np.asarray(_reference(x_big, B_big)),
        rtol=1e-4, atol=1e-4,
    )

    print("KERNEL_OK")
</pallas_src>

<mosaic_0001>
module attributes {stable_mosaic.version = 11 : i64} {
  func.func @_rff_kernel(%arg0: i32, %arg1: memref<8x2xf32, #tpu.memory_space<vmem>>, %arg2: memref<2x32xf32, #tpu.memory_space<vmem>>, %arg3: memref<8x64xf32, #tpu.memory_space<vmem>>) attributes {dimension_semantics = [#tpu.dimension_semantics<parallel>], iteration_bounds = array<i64: 1>, scalar_prefetch = 0 : i64, scratch_operands = 0 : i64, tpu.core_type = #tpu.core_type<tc>, window_params = [{transform_indices = @transform_0, window_bounds = array<i64: 8, 2>}, {pipeline_mode = #tpu.pipeline_mode<synchronous>, transform_indices = @transform_1, window_bounds = array<i64: 2, 32>}, {transform_indices = @transform_2, window_bounds = array<i64: 8, 64>}]} {
    %c0 = arith.constant 0 : index
    %c0_0 = arith.constant 0 : index
    %0 = vector.load %arg1[%c0, %c0_0] : memref<8x2xf32, #tpu.memory_space<vmem>>, vector<8x1xf32>
    %c0_1 = arith.constant 0 : index
    %c0_2 = arith.constant 0 : index
    %1 = vector.load %arg2[%c0_1, %c0_2] : memref<2x32xf32, #tpu.memory_space<vmem>>, vector<1x32xf32>
    %2 = vector.broadcast %0 : vector<8x1xf32> to vector<8x32xf32>
    %3 = vector.broadcast %1 : vector<1x32xf32> to vector<8x32xf32>
    %4 = arith.mulf %2, %3 : vector<8x32xf32>
    %c0_3 = arith.constant 0 : index
    %c1 = arith.constant 1 : index
    %5 = vector.load %arg1[%c0_3, %c1] : memref<8x2xf32, #tpu.memory_space<vmem>>, vector<8x1xf32>
    %c1_4 = arith.constant 1 : index
    %c0_5 = arith.constant 0 : index
    %6 = vector.load %arg2[%c1_4, %c0_5] : memref<2x32xf32, #tpu.memory_space<vmem>>, vector<1x32xf32>
    %7 = vector.broadcast %5 : vector<8x1xf32> to vector<8x32xf32>
    %8 = vector.broadcast %6 : vector<1x32xf32> to vector<8x32xf32>
    %9 = arith.mulf %7, %8 : vector<8x32xf32>
    %10 = arith.addf %4, %9 : vector<8x32xf32>
    %11 = math.cos %10 : vector<8x32xf32>
    %c0_6 = arith.constant 0 : index
    %c0_7 = arith.constant 0 : index
    %12 = vector.load %arg3[%c0_6, %c0_7] : memref<8x64xf32, #tpu.memory_space<vmem>>, vector<8x32xf32>
    tpu.vector_store %arg3[%c0_6, %c0_7], %11 {strides = array<i32>} : memref<8x64xf32, #tpu.memory_space<vmem>>, vector<8x32xf32>,
    %13 = math.sin %10 : vector<8x32xf32>
    %c0_8 = arith.constant 0 : index
    %c32 = arith.constant 32 : index
    %14 = vector.load %arg3[%c0_8, %c32] : memref<8x64xf32, #tpu.memory_space<vmem>>, vector<8x32xf32>
    tpu.vector_store %arg3[%c0_8, %c32], %13 {strides = array<i32>} : memref<8x64xf32, #tpu.memory_space<vmem>>, vector<8x32xf32>,
    return
  }
  func.func @transform_0(%arg0: i32) -> (i32, i32) {
    %c0_i32 = arith.constant 0 : i32
    %c0_i32_0 = arith.constant 0 : i32
    return %arg0, %c0_i32 : i32, i32
  }
  func.func @transform_1(%arg0: i32) -> (i32, i32) {
    %c0_i32 = arith.constant 0 : i32
    %c0_i32_0 = arith.constant 0 : i32
    %c0_i32_1 = arith.constant 0 : i32
    return %c0_i32, %c0_i32_0 : i32, i32
  }
  func.func @transform_2(%arg0: i32) -> (i32, i32) {
    %c0_i32 = arith.constant 0 : i32
    %c0_i32_0 = arith.constant 0 : i32
    return %arg0, %c0_i32 : i32, i32
  }
}

</mosaic_0001>

<bundles_post_ra>
// kernel: tpu_custom_call.1
= control target key start
LH: loop header
LB: loop body
LE: loop exit
PB: predicated region body
PF: predicated region fallthrough
CT: control target
= control target key end

     0   :  { %v318_v1 = vmov 0   ;;  %s386_s0 = inlined_call_operand.vmem [shape: f32[8,2], index: 0, kind: input, shape index: {}]   ;;  %s387_s1 = inlined_call_operand.vmem [shape: f32[2,32], index: 1, kind: input, shape index: {}]   ;;  %s388_s2 = inlined_call_operand.hbm [shape: f32[8,64], index: 2, kind: output, shape index: {}]  }
   0x1   :  { %v12_v0 = vld [vmem:[%s386_s0] sm:$0xff]  ;;  %288 = vset.pattern.permute.xlu0 %v318_v1 }
   0x2   :  { %7 = vsyncpa [#allocation3], 0  ;;  %16 = vperm.xlu0 %288, %v12_v0   ;;  %v319_v2 = vmov 1   ;;  %v264_v4 = vld [vmem:[%s387_s1] ss:$0 sm:$0xff]  ;;  %vm138_vm10 = vcmask 261120  }
   0x3   :  { %v265_v5 = vld [vmem:[%s387_s1 + $0x1] ss:$0 sm:$0xff]  ;;  %v320_v20 = vmov 683565275   ;;  %v321_v22 = vmov 2475754826  }
   0x4   :  { %v322_v25 = vmov 2131351028   ;;  %v323_v28 = vmov 2102212464   ;;  %v324_v31 = vmov 920167782  }
   0x5   :  { %v325_v34 = vmov 1326507024   ;;  %s326_s0 = smov 32   ;;  %s327_s1 = smov [#allocation2]  }
   0x6   :  { %289 = vset.pattern.permute.xlu0 %v319_v2  ;;  %s256_s15 = sshll.u32 %s327_s1, 4  ;;  %s257_s15 = int_to_ptr.vmem [resolvable:$true] %s256_s15 }
   0x7   :  { %26 = vperm.xlu0 %289, %v12_v0   ;;  %s294_s16 = scalar_lea.vmem %s257_s15, 128  ;;  %p299_p1 = scmp.lt.s32.totalorder %s257_s15, %s257_s15 }
   0x8   :  { %p295_p0 = scmp.ne.s32.totalorder %s257_s15, %s294_s16  ;;  %p300_p2 = scmp.lt.s32.totalorder %s294_s16, %s294_s16 }
   0xa   :  { %p301_p3 = por %p300_p2, %p299_p1 }
   0xc   :  { %p302_p4 = pnand %p301_p3, %p295_p0 }
  0x81   :  { %v17_v3 = vpop.permute.xlu0 %16 }
  0x82   :  { %v23_v7 = vmul.f32 %v264_v4, %v17_v3 }
  0x86   :  { %v27_v6 = vpop.permute.xlu0 %26 }
  0x87   :  { %v33_v8 = vmul.f32 %v265_v5, %v27_v6 }
  0x89   :  { %v352_v9 = vadd.f32 %v33_v8, %v23_v7 }
  0x8b   :  { %v38_v10 = vand.u32 2139095040, %v352_v9  ;;  %v35_v14 = vand.u32 2147483647, %v352_v9  ;;  %vm37_vm7 = vcmp.lt.s32.totalorder %v352_v9, 0 }
  0x8d   :  { %v39_v11 = vshrl.u32 %v38_v10, 23  ;;  %v42_v18 = vand.u32 8388607, %v35_v14  ;;  %vm36_vm8 = vcmp.le.f32.partialorder %v35_v14, 0.7853982 }
  0x8f   :  { %v266_v12 = vadd.s32 4294967169, %v39_v11  ;;  %v43_v36 = vor.u32 8388608, %v42_v18 }
  0x91   :  { %v45_v13 = vadd.s32 1, %v266_v12  ;;  %v83_v50 = vshll.u32 %v43_v36, 8 }
  0x93   :  { %vm46_vm0 = vcmp.gt.s32.totalorder %v45_v13, 0 }
  0x94   :  { %v47_v15 = vsel %vm46_vm0, %v45_v13, 0  ;;  %vm127_vm0 = vweird.f32 %v352_v9 }
  0x95   :  { %v49_v16 = vand.u32 31, %v47_v15  ;;  %v48_v19 = vshrl.u32 %v47_v15, 5 }
  0x97   :  { %v50_v17 = vsub.s32 32, %v49_v16  ;;  %v52_v21 = vshll.u32 %v320_v20, %v49_v16  ;;  %v55_v23 = vshll.u32 %v321_v22, %v49_v16  ;;  %v58_v27 = vshll.u32 %v322_v25, %v49_v16 }
  0x98   :  { %v61_v30 = vshll.u32 %v323_v28, %v49_v16  ;;  %v64_v33 = vshll.u32 %v324_v31, %v49_v16  ;;  %vm67_vm1 = vcmp.lt.s32.totalorder %v48_v19, 1  ;;  %vm70_vm2 = vcmp.lt.s32.totalorder %v48_v19, 4 }
  0x99   :  { %v53_v24 = vshrl.u32 %v321_v22, %v50_v17  ;;  %v56_v26 = vshrl.u32 %v322_v25, %v50_v17  ;;  %v59_v29 = vshrl.u32 %v323_v28, %v50_v17  ;;  %v62_v32 = vshrl.u32 %v324_v31, %v50_v17 }
  0x9a   :  { %v65_v35 = vshrl.u32 %v325_v34, %v50_v17  ;;  %v51_v45 = vshrl.u32 %v320_v20, %v50_v17  ;;  %vm69_vm3 = vcmp.lt.s32.totalorder %v48_v19, 3  ;;  %vm68_vm4 = vcmp.lt.s32.totalorder %v48_v19, 2 }
  0x9b   :  { %v54_v37 = vor.u32 %v53_v24, %v52_v21  ;;  %v57_v38 = vor.u32 %v56_v26, %v55_v23  ;;  %v60_v39 = vor.u32 %v59_v29, %v58_v27  ;;  %v63_v40 = vor.u32 %v62_v32, %v61_v30 }
  0x9c   :  { %v66_v41 = vor.u32 %v65_v35, %v64_v33 }
  0x9d   :  { %v72_v42 = vsel %vm70_vm2, %v60_v39, 2102212464  ;;  %v75_v43 = vsel %vm67_vm1, %v54_v37, %v57_v38  ;;  %v79_v44 = vsel %vm67_vm1, %v57_v38, %v60_v39  ;;  %v76_v46 = vsel %vm70_vm2, %v63_v40, 920167782 }
  0x9e   :  { %v80_v47 = vsel %vm70_vm2, %v66_v41, 1326507024  ;;  %v77_v48 = vsel %vm69_vm3, %v60_v39, %v76_v46  ;;  %v71_v51 = vsel %vm67_vm1, %v51_v45, %v54_v37  ;;  %v73_v52 = vsel %vm69_vm3, %v57_v38, %v72_v42 }
  0x9f   :  { %v81_v49 = vsel %vm69_vm3, %v63_v40, %v80_v47  ;;  %v78_v53 = vsel %vm68_vm4, %v75_v43, %v77_v48  ;;  %v74_v59 = vsel %vm68_vm4, %v71_v51, %v73_v52  ;;  %vm248_vm1 = vcmask 523520  }
  0xa0   :  { %v82_v54 = vsel %vm68_vm4, %v79_v44, %v81_v49  ;;  %v361_v57 = vmul.u32.u64.low %v83_v50, %v78_v53  ;;  %v362_v58 = vmul.u32.u64.high %v83_v50, %v78_v53, %v361_v57  ;;  %v90_v61 = vmul.u32 %v83_v50, %v74_v59 }
  0xa1   :  { %v358_v55 = vmul.u32.u64.low %v83_v50, %v82_v54  ;;  %v359_v56 = vmul.u32.u64.high %v83_v50, %v82_v54, %v358_v55 }
  0xa2   :  { %v93_v60 = vadd.s32 1, %v362_v58 }
  0xa3   :  { %vm92_vm5 = vc.u32 %v359_v56, %v361_v57  ;;  %v91_v10 = vadd.s32 %v361_v57, %v359_v56 }
  0xa4   :  { %v94_v62 = vsel %vm92_vm5, %v93_v60, %v362_v58 }
  0xa5   :  { %v95_v63 = vadd.s32 %v94_v62, %v90_v61 }
  0xa7   :  { %v96_v0 = vadd.s32 536870912, %v95_v63 }
  0xa9   :  { %v97_v1 = vshrl.u32 %v96_v0, 30 }
  0xab   :  { %v98_v2 = vshll.u32 %v97_v1, 30  ;;  %v121_v23 = vsub.s32 4, %v97_v1 }
  0xad   :  { %v99_v3 = vsub.s32 %v95_v63, %v98_v2  ;;  %v122_v26 = vsel %vm37_vm7, %v121_v23, %v97_v1 }
  0xae   :  { %v124_v28 = vsel %vm36_vm8, 0, %v122_v26 }
  0xaf   :  { %v101_v4 = vsub.s32 0, %v99_v3  ;;  %v233_v29 = vadd.s32 3, %v124_v28  ;;  %v128_v30 = vand.u32 3, %v124_v28 }
  0xb1   :  { %v267_v5 = vmin.u32 %v101_v4, %v99_v3  ;;  %v234_v31 = vand.u32 3, %v233_v29  ;;  %vm133_vm9 = vcmp.eq.s32.totalorder %v128_v30, 2  ;;  %vm130_vm12 = vcmp.eq.s32.totalorder %v128_v30, 0 }
  0xb2   :  { %vm129_vm14 = vcmp.lt.s32.totalorder %v128_v30, 2 }
  0xb3   :  { %v103_v6 = vclz %v267_v5  ;;  %vm239_vm11 = vcmp.eq.s32.totalorder %v234_v31, 2  ;;  %vm236_vm13 = vcmp.eq.s32.totalorder %v234_v31, 0  ;;  %vm235_vm15 = vcmp.lt.s32.totalorder %v234_v31, 2 }
  0xb5   :  { %v268_v7 = vadd.s32 4294967294, %v103_v6 }
  0xb7   :  { %vm269_vm6 = vcmp.lt.s32.totalorder %v268_v7, 0 }
  0xb8   :  { %v106_v8 = vsel %vm269_vm6, 0, %v268_v7 }
  0xb9   :  { %v107_v11 = vsub.s32 32, %v106_v8  ;;  %v111_v12 = vsub.s32 4294967266, %v106_v8  ;;  %v108_v13 = vshll.u32 %v99_v3, %v106_v8 }
  0xbb   :  { %v109_v15 = vshrl.u32 %v91_v10, %v107_v11  ;;  %v112_v16 = vadd.s32 127, %v111_v12 }
  0xbd   :  { %v110_v17 = vor.u32 %v109_v15, %v108_v13  ;;  %v113_v18 = vshll.u32 %v112_v16, 23 }
  0xbf   :  { %v114_v19 = vor.u32 4788187, %v113_v18  ;;  %v117_v21 = vcvt.s32.f32 %v110_v17 }
  0xc1   :  { %v115_v20 = vand.u32 2147483647, %v114_v19 }
  0xc3   :  { %v118_v22 = vmul.f32 %v117_v21, %v115_v20 }
  0xc5   :  { %v119_v24 = vxor.u32 2147483648, %v118_v22 }
  0xc7   :  { %v120_v25 = vsel %vm37_vm7, %v119_v24, %v118_v22 }
  0xc8   :  { %v123_v27 = vsel %vm36_vm8, %v352_v9, %v120_v25 }
  0xc9   :  { %290 = vcosq.f32 %v123_v27 }
  0xca   :  { %292 = vsinq.f32 %v123_v27 }
  0xd3   :  { %v291_v32 = vpop.eup %290 }
  0xd4   :  { %v293_v33 = vpop.eup %292  ;;  %v134_v34 = vxor.u32 2147483648, %v291_v32 }
  0xd5   :  { %v131_v35 = vxor.u32 2147483648, %v293_v33 }
  0xd6   :  { %v241_v14 = vsel %vm239_vm11, %v134_v34, %v293_v33  ;;  %v135_v36 = vsel %vm133_vm9, %v134_v34, %v293_v33 }
  0xd7   :  { %v238_v37 = vsel %vm236_vm13, %v291_v32, %v131_v35  ;;  %v132_v38 = vsel %vm130_vm12, %v291_v32, %v131_v35 }
  0xd8   :  { %v242_v39 = vsel %vm235_vm15, %v238_v37, %v241_v14  ;;  %v136_v40 = vsel %vm129_vm14, %v132_v38, %v135_v36 }
  0xd9   :  { %v243_v41 = vsel %vm127_vm0, nan, %v242_v39  ;;  %v137_v42 = vsel %vm127_vm0, nan, %v136_v40 }
  0xda   :  { %245 = vrot.lane.b32.xlu1 %v243_v41, %s326_s0  ;;  %139 = vst.msk [vmem:[#allocation2] sm:$0xff] %vm138_vm10, %v137_v42 }
 0x14c   :  { %v246_v43 = vpop.permute.xlu1 %245 }
 0x14d   :  { %249 = vst.msk [vmem:[#allocation2] sm:$0xff] %vm248_vm1, %v246_v43 }
 0x14e   :  { %305 = shalt.err (!%p302_p4)
}
 0x14f   :  { %s306_s19 = scalar_lea.hbm %s388_s2, 128 }
 0x150   :  { %p307_p5 = scmp.ne.s32.totalorder %s388_s2, %s306_s19  ;;  %p310_p6 = scmp.lt.u32.totalorder %s306_s19, %s388_s2 }
 0x152   :  { %p312_p7 = pnand %p310_p6, %p307_p5 }
 0x154   :  { %315 = shalt.err (!%p312_p7)
}
 0x155   :  { %259 = dma.vmem_to_hbm [thread:$0]  %s257_s15, 128, %s388_s2, [#allocation3]  }
 0x156   :  { %316 = dma.done.wait [#allocation3], 128  }
 0x157   :  { %317 = vsyncadd [#allocation3], 4294967168 }
 0x158   :  { %263 = vsyncpa [#allocation3], 1 }

</bundles_post_ra>
